<compile_context>
chip_gen: v7x
topology: tpu7x:2x2x1
jax: 0.10.0
libtpu: 0.0.40
codegen_flags: <defaults>
</compile_context>

<pallas_src>
import functools

import jax
import jax.numpy as jnp
from jax.experimental import pallas as pl
from jax.experimental.pallas import tpu as pltpu


# ----------------------------------------------------------------------------
# Fused kernel: mask one patch per batch -> dense+tanh "model" -> patch_head
#               -> per-block partial SSE
# ----------------------------------------------------------------------------
def _fused_patch_train_kernel(
    idx_ref,          # SMEM (bs,) i32     scalar-prefetch: removed patch index per batch
    x_ref,            # (TB*n_patches, patch)  f32    image patches (flattened rows)
    wm_ref,           # (patch, hidden)        bf16   synthetic wrapped-model weight
    bm_ref,           # (1, hidden)            f32
    wh_ref,           # (hidden, patch)        bf16   patch_head weight
    bh_ref,           # (1, patch)             f32
    masked_ref,       # (TB*n_patches, patch)  f32    out: masked patches
    removed_ref,      # (TB, patch)            f32    out: removed patch per batch
    hidden_ref,       # (TB*n_patches, hidden) f32    out: hidden_states[-1]
    patch_out_ref,    # (TB*n_patches, patch)  f32    out: patch_head output
    sse_ref,          # (1, 1)                 f32    out: per-block partial sum of sq. err
    *,
    n_patches: int,
    batch_tile: int,
    compute_dtype,
):
    b = pl.program_id(0)

    # ---- 1) mask a single patch per batch element (dynamic row load/store) ----
    masked_ref[...] = x_ref[...]
    removed_rows = []
    for lb in range(batch_tile):                     # static unroll, batch_tile is small
        row = lb * n_patches + idx_ref[b * batch_tile + lb]
        r = x_ref[pl.ds(row, 1), :]                  # (1, patch) removed patch
        removed_rows.append(r)
        removed_ref[pl.ds(lb, 1), :] = r
        masked_ref[pl.ds(row, 1), :] = jnp.zeros_like(r)   # mask_to = 0.0

    # ---- 2) wrapped "model": dense + tanh (bf16 MXU operands, f32 accumulate) ----
    # TODO(synk): the real wrapped LM forward is external; represented by one dense+tanh.
    xm = masked_ref[...].astype(compute_dtype)
    h = jnp.dot(xm, wm_ref[...], preferred_element_type=jnp.float32)
    h = jnp.tanh(h + bm_ref[...])                    # f32 epilogue (v5e-safe)
    hidden_ref[...] = h.astype(hidden_ref.dtype)

    # ---- 3) patch_head: Linear(hidden -> patch), consumed from VMEM (no HBM re-read) ----
    p = jnp.dot(h.astype(compute_dtype), wh_ref[...],
                preferred_element_type=jnp.float32) + bh_ref[...]
    patch_out_ref[...] = p.astype(patch_out_ref.dtype)

    # ---- 4) partial SSE for this block (removed patch broadcast over seq) ----
    sse = jnp.zeros((1, 1), jnp.float32)
    for lb in range(batch_tile):
        d = p[lb * n_patches:(lb + 1) * n_patches, :] - removed_rows[lb]
        sse = sse + jnp.sum(d * d)
    sse_ref[...] = sse


def patch_train_forward(image_patches, patch_idx, w_model, b_model, w_head, b_head,
                        *, batch_tile=None, compute_dtype=jnp.bfloat16):
    bs, n_patches, patch_size = image_patches.shape
    hidden = w_model.shape[1]

    tb = batch_tile if batch_tile is not None else bs
    assert bs % tb == 0, "batch_tile must divide batch size"
    nb = bs // tb
    rows = tb * n_patches

    x_flat = image_patches.reshape(bs * n_patches, patch_size)   # free bitcast reshape

    # Cast matmul weights to the MXU compute dtype ONCE outside the kernel
    # (halves weight DMA bytes and removes per-grid-step VPU casts).
    wm = w_model.astype(compute_dtype)
    wh = w_head.astype(compute_dtype)

    kernel = functools.partial(
        _fused_patch_train_kernel,
        n_patches=n_patches, batch_tile=tb, compute_dtype=compute_dtype,
    )

    grid_spec = pltpu.PrefetchScalarGridSpec(
        num_scalar_prefetch=1,
        grid=(nb,),
        in_specs=[
            pl.BlockSpec((rows, patch_size), lambda b, idx: (b, 0)),
            pl.BlockSpec((patch_size, hidden), lambda b, idx: (0, 0)),
            pl.BlockSpec((1, hidden), lambda b, idx: (0, 0)),
            pl.BlockSpec((hidden, patch_size), lambda b, idx: (0, 0)),
            pl.BlockSpec((1, patch_size), lambda b, idx: (0, 0)),
        ],
        out_specs=[
            pl.BlockSpec((rows, patch_size), lambda b, idx: (b, 0)),
            # leading block-index dim squeezed -> kernel sees (tb, patch)
            pl.BlockSpec((None, tb, patch_size), lambda b, idx: (b, 0, 0)),
            pl.BlockSpec((rows, hidden), lambda b, idx: (b, 0)),
            pl.BlockSpec((rows, patch_size), lambda b, idx: (b, 0)),
            # per-block partial SSE (disjoint slot per grid step -> "parallel"-safe)
            pl.BlockSpec((None, 1, 1), lambda b, idx: (b, 0, 0)),
        ],
    )

    masked_flat, removed, hidden_flat, patch_out_flat, sse = pl.pallas_call(
        kernel,
        grid_spec=grid_spec,
        out_shape=(
            jax.ShapeDtypeStruct((bs * n_patches, patch_size), image_patches.dtype),
            jax.ShapeDtypeStruct((nb, tb, patch_size), image_patches.dtype),
            jax.ShapeDtypeStruct((bs * n_patches, hidden), jnp.float32),
            jax.ShapeDtypeStruct((bs * n_patches, patch_size), jnp.float32),
            jax.ShapeDtypeStruct((nb, 1, 1), jnp.float32),
        ),
        compiler_params=pltpu.CompilerParams(
            dimension_semantics=("parallel",),
            # Small demo blocks; re-derive batch_tile / this limit for realistic
            # seq/hidden (v7x has only 64 MiB physical VMEM).
            vmem_limit_bytes=32 * 1024 * 1024,
        ),
    )(patch_idx, x_flat, wm, b_model, wh, b_head)

    masked = masked_flat.reshape(bs, n_patches, patch_size)
    hidden_states = hidden_flat.reshape(bs, n_patches, hidden)
    patch_out = patch_out_flat.reshape(bs, n_patches, patch_size)
    removed = removed.reshape(bs, patch_size)
    # 'mean' reduction of the MSE: final sum of per-block partials + divide (wrapper side).
    loss = jnp.sum(sse) / (bs * n_patches * patch_size)
    return masked, removed, hidden_states, patch_out, loss


# ----------------------------------------------------------------------------
# Wrapper (glue): parameter init, random-valid-patch selection, composition
# ----------------------------------------------------------------------------
class PatchTrainWrapper:
    def __init__(self, image_patch_size: int, hidden_size: int, key):
        k1, k2, k3, k4 = jax.random.split(key, 4)
        # synthetic wrapped model (single dense layer + tanh)
        self.w_model = 0.05 * jax.random.normal(k1, (image_patch_size, hidden_size), jnp.float32)
        self.b_model = 0.05 * jax.random.normal(k2, (1, hidden_size), jnp.float32)
        # patch_head: Linear(hidden_size, image_patch_size)
        self.w_head = 0.05 * jax.random.normal(k3, (hidden_size, image_patch_size), jnp.float32)
        self.b_head = 0.05 * jax.random.normal(k4, (1, image_patch_size), jnp.float32)

    def __call__(self, image_patches, image_patches_indices, key, batch_tile=None):
        bs, n_patches, _ = image_patches.shape

        # random.choice over valid (!= -1) patch positions, per batch (host/JAX glue)
        valid = image_patches_indices != -1
        scores = jnp.where(valid, jax.random.uniform(key, (bs, n_patches)), -jnp.inf)
        patch_idx = jnp.argmax(scores, axis=1).astype(jnp.int32)

        masked, removed, hidden, patch_out, patch_loss = patch_train_forward(
            image_patches, patch_idx,
            self.w_model, self.b_model, self.w_head, self.b_head,
            batch_tile=batch_tile,
        )

        base_loss = jnp.float32(0.0)  # TODO(synk): real wrapped LM loss is external, not reproducible here
        return {
            "loss": base_loss + patch_loss,
            "hidden_states": hidden,
            "patch_out": patch_out,
            "masked_image_patches": masked,
            "patches_removed": removed,
            "patch_removed_indices": patch_idx,
        }


if __name__ == "__main__":
    key = jax.random.PRNGKey(0)
    k_param, k_data, k_sel = jax.random.split(key, 3)

    # lane-dense demo shapes (patch_size / hidden multiples of 128)
    bs, n_patches, patch_size, hidden_size = 4, 8, 128, 128

    image_patches = jax.random.normal(k_data, (bs, n_patches, patch_size), jnp.float32)
    # last two patch slots of each example are padding (-1)
    image_patches_indices = jnp.where(
        jnp.arange(n_patches)[None, :] < n_patches - 2,
        jnp.tile(jnp.arange(n_patches)[None, :], (bs, 1)),
        -1,
    ).astype(jnp.int32)

    wrapper = PatchTrainWrapper(patch_size, hidden_size, k_param)
    outputs = wrapper(image_patches, image_patches_indices, k_sel, batch_tile=2)
    jax.block_until_ready(outputs)

    # ---- sanity checks against a pure-JAX reference (same bf16 matmul operands) ----
    idx = outputs["patch_removed_indices"]
    assert bool(jnp.all(image_patches_indices[jnp.arange(bs), idx] != -1))

    masked_ref = image_patches.at[jnp.arange(bs), idx].set(0.0)
    removed_ref = image_patches[jnp.arange(bs), idx]
    cd = jnp.bfloat16
    h_ref = jnp.tanh(
        jnp.dot(masked_ref.reshape(bs * n_patches, patch_size).astype(cd),
                wrapper.w_model.astype(cd), preferred_element_type=jnp.float32)
        + wrapper.b_model)
    p_ref = (jnp.dot(h_ref.astype(cd), wrapper.w_head.astype(cd),
                     preferred_element_type=jnp.float32) + wrapper.b_head)
    h_ref = h_ref.reshape(bs, n_patches, hidden_size)
    p_ref = p_ref.reshape(bs, n_patches, patch_size)
    loss_ref = jnp.mean((p_ref - removed_ref[:, None, :]) ** 2)

    assert jnp.allclose(outputs["masked_image_patches"], masked_ref, atol=1e-6)
    assert jnp.allclose(outputs["patches_removed"], removed_ref, atol=1e-6)
    assert jnp.allclose(outputs["hidden_states"], h_ref, atol=5e-3)
    assert jnp.allclose(outputs["patch_out"], p_ref, atol=2e-2)
    assert jnp.allclose(outputs["loss"], loss_ref, rtol=1e-2, atol=1e-3)

    print("KERNEL_OK")
</pallas_src>

<mosaic_0001>
module attributes {stable_mosaic.version = 11 : i64} {
  func.func @_fused_patch_train_kernel(%arg0: i32, %arg1: memref<4xi32, #tpu.memory_space<smem>>, %arg2: memref<16x128xf32, #tpu.memory_space<vmem>>, %arg3: memref<128x128xbf16, #tpu.memory_space<vmem>>, %arg4: memref<1x128xf32, #tpu.memory_space<vmem>>, %arg5: memref<128x128xbf16, #tpu.memory_space<vmem>>, %arg6: memref<1x128xf32, #tpu.memory_space<vmem>>, %arg7: memref<16x128xf32, #tpu.memory_space<vmem>>, %arg8: memref<1x2x128xf32, #tpu.memory_space<vmem>>, %arg9: memref<16x128xf32, #tpu.memory_space<vmem>>, %arg10: memref<16x128xf32, #tpu.memory_space<vmem>>, %arg11: memref<1x1x1xf32, #tpu.memory_space<vmem>>) attributes {dimension_semantics = [#tpu.dimension_semantics<parallel>], iteration_bounds = array<i64: 2>, scalar_prefetch = 1 : i64, scratch_operands = 0 : i64, tpu.core_type = #tpu.core_type<tc>, window_params = [{transform_indices = @transform_0, window_bounds = array<i64: 16, 128>}, {pipeline_mode = #tpu.pipeline_mode<synchronous>, transform_indices = @transform_1, window_bounds = array<i64: 128, 128>}, {pipeline_mode = #tpu.pipeline_mode<synchronous>, transform_indices = @transform_2, window_bounds = array<i64: 1, 128>}, {pipeline_mode = #tpu.pipeline_mode<synchronous>, transform_indices = @transform_3, window_bounds = array<i64: 128, 128>}, {pipeline_mode = #tpu.pipeline_mode<synchronous>, transform_indices = @transform_4, window_bounds = array<i64: 1, 128>}, {transform_indices = @transform_5, window_bounds = array<i64: 16, 128>}, {transform_indices = @transform_6, window_bounds = array<i64: 1, 2, 128>}, {transform_indices = @transform_7, window_bounds = array<i64: 16, 128>}, {transform_indices = @transform_8, window_bounds = array<i64: 16, 128>}, {transform_indices = @transform_9, window_bounds = array<i64: 1, 1, 1>}]} {
    %c0 = arith.constant 0 : index
    %c0_0 = arith.constant 0 : index
    %0 = vector.load %arg2[%c0, %c0_0] : memref<16x128xf32, #tpu.memory_space<vmem>>, vector<16x128xf32>
    %c0_1 = arith.constant 0 : index
    %c0_2 = arith.constant 0 : index
    %1 = vector.load %arg7[%c0_1, %c0_2] : memref<16x128xf32, #tpu.memory_space<vmem>>, vector<16x128xf32>
    tpu.vector_store %arg7[%c0_1, %c0_2], %0 {strides = array<i32>} : memref<16x128xf32, #tpu.memory_space<vmem>>, vector<16x128xf32>,
    %c2_i32 = arith.constant 2 : i32
    %2 = arith.muli %arg0, %c2_i32 : i32
    %c0_i32 = arith.constant 0 : i32
    %3 = arith.addi %2, %c0_i32 : i32
    %4 = arith.index_cast %3 : i32 to index
    %5 = memref.load %arg1[%4] : memref<4xi32, #tpu.memory_space<smem>>
    %c0_i32_3 = arith.constant 0 : i32
    %6 = arith.addi %c0_i32_3, %5 : i32
    %7 = arith.index_cast %6 : i32 to index
    %c0_4 = arith.constant 0 : index
    %8 = vector.load %arg2[%7, %c0_4] : memref<16x128xf32, #tpu.memory_space<vmem>>, vector<1x128xf32>
    %c0_5 = arith.constant 0 : index
    %c0_6 = arith.constant 0 : index
    %c0_7 = arith.constant 0 : index
    %9 = vector.load %arg8[%c0_5, %c0_6, %c0_7] : memref<1x2x128xf32, #tpu.memory_space<vmem>>, vector<1x1x128xf32>
    %10 = vector.shape_cast %9 : vector<1x1x128xf32> to vector<1x128xf32>
    %11 = vector.shape_cast %8 : vector<1x128xf32> to vector<1x1x128xf32>
    tpu.vector_store %arg8[%c0_5, %c0_6, %c0_7], %11 {strides = array<i32>} : memref<1x2x128xf32, #tpu.memory_space<vmem>>, vector<1x1x128xf32>,
    %cst = arith.constant 0.000000e+00 : f32
    %12 = vector.broadcast %cst : f32 to vector<1x128xf32>
    %13 = arith.index_cast %6 : i32 to index
    %c0_8 = arith.constant 0 : index
    %14 = vector.load %arg7[%13, %c0_8] : memref<16x128xf32, #tpu.memory_space<vmem>>, vector<1x128xf32>
    tpu.vector_store %arg7[%13, %c0_8], %12 {strides = array<i32>} : memref<16x128xf32, #tpu.memory_space<vmem>>, vector<1x128xf32>,
    %c2_i32_9 = arith.constant 2 : i32
    %15 = arith.muli %arg0, %c2_i32_9 : i32
    %c1_i32 = arith.constant 1 : i32
    %16 = arith.addi %15, %c1_i32 : i32
    %17 = arith.index_cast %16 : i32 to index
    %18 = memref.load %arg1[%17] : memref<4xi32, #tpu.memory_space<smem>>
    %c8_i32 = arith.constant 8 : i32
    %19 = arith.addi %c8_i32, %18 : i32
    %20 = arith.index_cast %19 : i32 to index
    %c0_10 = arith.constant 0 : index
    %21 = vector.load %arg2[%20, %c0_10] : memref<16x128xf32, #tpu.memory_space<vmem>>, vector<1x128xf32>
    %c0_11 = arith.constant 0 : index
    %c1 = arith.constant 1 : index
    %c0_12 = arith.constant 0 : index
    %22 = vector.load %arg8[%c0_11, %c1, %c0_12] : memref<1x2x128xf32, #tpu.memory_space<vmem>>, vector<1x1x128xf32>
    %23 = vector.shape_cast %22 : vector<1x1x128xf32> to vector<1x128xf32>
    %24 = vector.shape_cast %21 : vector<1x128xf32> to vector<1x1x128xf32>
    tpu.vector_store %arg8[%c0_11, %c1, %c0_12], %24 {strides = array<i32>} : memref<1x2x128xf32, #tpu.memory_space<vmem>>, vector<1x1x128xf32>,
    %cst_13 = arith.constant 0.000000e+00 : f32
    %25 = vector.broadcast %cst_13 : f32 to vector<1x128xf32>
    %26 = arith.index_cast %19 : i32 to index
    %c0_14 = arith.constant 0 : index
    %27 = vector.load %arg7[%26, %c0_14] : memref<16x128xf32, #tpu.memory_space<vmem>>, vector<1x128xf32>
    tpu.vector_store %arg7[%26, %c0_14], %25 {strides = array<i32>} : memref<16x128xf32, #tpu.memory_space<vmem>>, vector<1x128xf32>,
    %c0_15 = arith.constant 0 : index
    %c0_16 = arith.constant 0 : index
    %28 = vector.load %arg7[%c0_15, %c0_16] : memref<16x128xf32, #tpu.memory_space<vmem>>, vector<16x128xf32>
    %29 = arith.truncf %28 : vector<16x128xf32> to vector<16x128xbf16>
    %c0_17 = arith.constant 0 : index
    %c0_18 = arith.constant 0 : index
    %30 = vector.load %arg3[%c0_17, %c0_18] : memref<128x128xbf16, #tpu.memory_space<vmem>>, vector<128x128xbf16>
    %cst_19 = arith.constant dense<0.000000e+00> : vector<16x128xf32>
    %31 = tpu.matmul %29, %30, %cst_19 {dimension_numbers = #tpu.dot_dimension_numbers<[1], [0], [0], [1], [0, 0, 1, 1], [], []>} : vector<16x128xbf16>, vector<128x128xbf16>, vector<16x128xf32> -> vector<16x128xf32>
    %c0_20 = arith.constant 0 : index
    %c0_21 = arith.constant 0 : index
    %32 = vector.load %arg4[%c0_20, %c0_21] : memref<1x128xf32, #tpu.memory_space<vmem>>, vector<1x128xf32>
    %33 = vector.broadcast %32 : vector<1x128xf32> to vector<16x128xf32>
    %34 = arith.addf %31, %33 : vector<16x128xf32>
    %35 = math.tanh %34 : vector<16x128xf32>
    %c0_22 = arith.constant 0 : index
    %c0_23 = arith.constant 0 : index
    %36 = vector.load %arg9[%c0_22, %c0_23] : memref<16x128xf32, #tpu.memory_space<vmem>>, vector<16x128xf32>
    tpu.vector_store %arg9[%c0_22, %c0_23], %35 {strides = array<i32>} : memref<16x128xf32, #tpu.memory_space<vmem>>, vector<16x128xf32>,
    %37 = arith.truncf %35 : vector<16x128xf32> to vector<16x128xbf16>
    %c0_24 = arith.constant 0 : index
    %c0_25 = arith.constant 0 : index
    %38 = vector.load %arg5[%c0_24, %c0_25] : memref<128x128xbf16, #tpu.memory_space<vmem>>, vector<128x128xbf16>
    %cst_26 = arith.constant dense<0.000000e+00> : vector<16x128xf32>
    %39 = tpu.matmul %37, %38, %cst_26 {dimension_numbers = #tpu.dot_dimension_numbers<[1], [0], [0], [1], [0, 0, 1, 1], [], []>} : vector<16x128xbf16>, vector<128x128xbf16>, vector<16x128xf32> -> vector<16x128xf32>
    %c0_27 = arith.constant 0 : index
    %c0_28 = arith.constant 0 : index
    %40 = vector.load %arg6[%c0_27, %c0_28] : memref<1x128xf32, #tpu.memory_space<vmem>>, vector<1x128xf32>
    %41 = vector.broadcast %40 : vector<1x128xf32> to vector<16x128xf32>
    %42 = arith.addf %39, %41 : vector<16x128xf32>
    %c0_29 = arith.constant 0 : index
    %c0_30 = arith.constant 0 : index
    %43 = vector.load %arg10[%c0_29, %c0_30] : memref<16x128xf32, #tpu.memory_space<vmem>>, vector<16x128xf32>
    tpu.vector_store %arg10[%c0_29, %c0_30], %42 {strides = array<i32>} : memref<16x128xf32, #tpu.memory_space<vmem>>, vector<16x128xf32>,
    %cst_31 = arith.constant 0.000000e+00 : f32
    %44 = vector.broadcast %cst_31 : f32 to vector<1x1xf32>
    %45 = vector.extract_strided_slice %42 {offsets = [0, 0], sizes = [8, 128], strides = [1, 1]} : vector<16x128xf32> to vector<8x128xf32>
    %46 = vector.broadcast %8 : vector<1x128xf32> to vector<8x128xf32>
    %47 = arith.subf %45, %46 : vector<8x128xf32>
    %48 = arith.mulf %47, %47 : vector<8x128xf32>
    %49 = vector.shape_cast %48 : vector<8x128xf32> to vector<1x8x128xf32>
    %cst_32 = arith.constant dense<0.000000e+00> : vector<1xf32>
    %50 = vector.multi_reduction <add>, %49, %cst_32 [1, 2] : vector<1x8x128xf32> to vector<1xf32>
    %51 = vector.shape_cast %50 : vector<1xf32> to vector<1x1x1xf32>
    %52 = vector.extract %51[0, 0, 0] : f32 from vector<1x1x1xf32>
    %53 = vector.broadcast %52 : f32 to vector<1x1xf32>
    %54 = arith.addf %44, %53 : vector<1x1xf32>
    %55 = vector.extract_strided_slice %42 {offsets = [8, 0], sizes = [8, 128], strides = [1, 1]} : vector<16x128xf32> to vector<8x128xf32>
    %56 = vector.broadcast %21 : vector<1x128xf32> to vector<8x128xf32>
    %57 = arith.subf %55, %56 : vector<8x128xf32>
    %58 = arith.mulf %57, %57 : vector<8x128xf32>
    %59 = vector.shape_cast %58 : vector<8x128xf32> to vector<1x8x128xf32>
    %cst_33 = arith.constant dense<0.000000e+00> : vector<1xf32>
    %60 = vector.multi_reduction <add>, %59, %cst_33 [1, 2] : vector<1x8x128xf32> to vector<1xf32>
    %61 = vector.shape_cast %60 : vector<1xf32> to vector<1x1x1xf32>
    %62 = vector.extract %61[0, 0, 0] : f32 from vector<1x1x1xf32>
    %63 = vector.broadcast %62 : f32 to vector<1x1xf32>
    %64 = arith.addf %54, %63 : vector<1x1xf32>
    %c0_34 = arith.constant 0 : index
    %c0_35 = arith.constant 0 : index
    %c0_36 = arith.constant 0 : index
    %65 = vector.load %arg11[%c0_34, %c0_35, %c0_36] : memref<1x1x1xf32, #tpu.memory_space<vmem>>, vector<1x1x1xf32>
    %66 = vector.shape_cast %65 : vector<1x1x1xf32> to vector<1x1xf32>
    %67 = vector.shape_cast %64 : vector<1x1xf32> to vector<1x1x1xf32>
    tpu.vector_store %arg11[%c0_34, %c0_35, %c0_36], %67 {strides = array<i32>} : memref<1x1x1xf32, #tpu.memory_space<vmem>>, vector<1x1x1xf32>,
    return
  }
  func.func @transform_0(%arg0: i32, %arg1: memref<4xi32, #tpu.memory_space<smem>>) -> (i32, i32) {
    %c0_i32 = arith.constant 0 : i32
    %c0_i32_0 = arith.constant 0 : i32
    return %arg0, %c0_i32 : i32, i32
  }
  func.func @transform_1(%arg0: i32, %arg1: memref<4xi32, #tpu.memory_space<smem>>) -> (i32, i32) {
    %c0_i32 = arith.constant 0 : i32
    %c0_i32_0 = arith.constant 0 : i32
    %c0_i32_1 = arith.constant 0 : i32
    return %c0_i32, %c0_i32_0 : i32, i32
  }
  func.func @transform_2(%arg0: i32, %arg1: memref<4xi32, #tpu.memory_space<smem>>) -> (i32, i32) {
    %c0_i32 = arith.constant 0 : i32
    %c0_i32_0 = arith.constant 0 : i32
    %c0_i32_1 = arith.constant 0 : i32
    return %c0_i32, %c0_i32_0 : i32, i32
  }
  func.func @transform_3(%arg0: i32, %arg1: memref<4xi32, #tpu.memory_space<smem>>) -> (i32, i32) {
    %c0_i32 = arith.constant 0 : i32
    %c0_i32_0 = arith.constant 0 : i32
    %c0_i32_1 = arith.constant 0 : i32
    return %c0_i32, %c0_i32_0 : i32, i32
  }
  func.func @transform_4(%arg0: i32, %arg1: memref<4xi32, #tpu.memory_space<smem>>) -> (i32, i32) {
    %c0_i32 = arith.constant 0 : i32
    %c0_i32_0 = arith.constant 0 : i32
    %c0_i32_1 = arith.constant 0 : i32
    return %c0_i32, %c0_i32_0 : i32, i32
  }
  func.func @transform_5(%arg0: i32, %arg1: memref<4xi32, #tpu.memory_space<smem>>) -> (i32, i32) {
    %c0_i32 = arith.constant 0 : i32
    %c0_i32_0 = arith.constant 0 : i32
    return %arg0, %c0_i32 : i32, i32
  }
  func.func @transform_6(%arg0: i32, %arg1: memref<4xi32, #tpu.memory_space<smem>>) -> (i32, i32, i32) {
    %c0_i32 = arith.constant 0 : i32
    %c0_i32_0 = arith.constant 0 : i32
    %c0_i32_1 = arith.constant 0 : i32
    return %arg0, %c0_i32, %c0_i32_0 : i32, i32, i32
  }
  func.func @transform_7(%arg0: i32, %arg1: memref<4xi32, #tpu.memory_space<smem>>) -> (i32, i32) {
    %c0_i32 = arith.constant 0 : i32
    %c0_i32_0 = arith.constant 0 : i32
    return %arg0, %c0_i32 : i32, i32
  }
  func.func @transform_8(%arg0: i32, %arg1: memref<4xi32, #tpu.memory_space<smem>>) -> (i32, i32) {
    %c0_i32 = arith.constant 0 : i32
    %c0_i32_0 = arith.constant 0 : i32
    return %arg0, %c0_i32 : i32, i32
  }
  func.func @transform_9(%arg0: i32, %arg1: memref<4xi32, #tpu.memory_space<smem>>) -> (i32, i32, i32) {
    %c0_i32 = arith.constant 0 : i32
    %c0_i32_0 = arith.constant 0 : i32
    %c0_i32_1 = arith.constant 0 : i32
    return %arg0, %c0_i32, %c0_i32_0 : i32, i32, i32
  }
}

</mosaic_0001>

<bundles_post_ra>
// kernel: tpu_custom_call.1
= control target key start
LH: loop header
LB: loop body
LE: loop exit
PB: predicated region body
PF: predicated region fallthrough
CT: control target
= control target key end

     0   :  { %s1988_s0 = inlined_call_operand.hbm [shape: s32[4], index: 0, kind: input, shape index: {}]   ;;  %s1989_s1 = inlined_call_operand.hbm [shape: f32[32,128], index: 1, kind: input, shape index: {}]   ;;  %s1990_s2 = inlined_call_operand.hbm [shape: bf16[128,128], index: 2, kind: input, shape index: {}]   ;;  %s1991_s3 = inlined_call_operand.vmem [shape: f32[1,128], index: 3, kind: input, shape index: {}]   ;;  %s1992_s4 = inlined_call_operand.hbm [shape: bf16[128,128], index: 4, kind: input, shape index: {}]   ;;  %s1993_s5 = inlined_call_operand.vmem [shape: f32[1,128], index: 5, kind: input, shape index: {}]   ;;  %s1994_s6 = inlined_call_operand.hbm [shape: f32[32,128], index: 6, kind: output, shape index: {0}]   ;;  %s1995_s7 = inlined_call_operand.hbm [shape: f32[2,2,128], index: 7, kind: output, shape index: {1}]   ;;  %s1996_s8 = inlined_call_operand.hbm [shape: f32[32,128], index: 8, kind: output, shape index: {2}]   ;;  %s1997_s9 = inlined_call_operand.hbm [shape: f32[32,128], index: 9, kind: output, shape index: {3}]   ;;  %s1998_s10 = inlined_call_operand.vmem [shape: f32[2,1,1], index: 10, kind: output, shape index: {4}]  }
   0x1   :  { %2004 = sst [smem:[#allocation23_spill]] %s1989_s1  ;;  %s1232_s15 = scalar_lea.hbm %s1988_s0, 16 }
   0x2   :  { %2005 = sst [smem:[#allocation24_spill]] %s1990_s2  ;;  %p1233_p0 = scmp.ne.s32.totalorder %s1988_s0, %s1232_s15 }
   0x3   :  { %2006 = sst [smem:[#allocation25_spill]] %s1991_s3  ;;  %p1236_p1 = scmp.lt.u32.totalorder %s1232_s15, %s1988_s0 }
   0x4   :  { %2007 = sst [smem:[#allocation26_spill]] %s1992_s4 }
   0x5   :  { %p1238_p2 = pnand %p1236_p1, %p1233_p0 }
   0x7   :  { %1241 = shalt.err (!%p1238_p2)  }
   0x8   :  { %s1494_s20 = smov [#allocation3]  }
   0x9   :  { %17 = dma.hbm_to_smem %s1988_s0, 16, %s1494_s20, [#allocation2] }
   0xa   :  { %1456 = dma.done.wait [#allocation2], 16 }
   0xb   :  { %1457 = vsyncadd [#allocation2], 4294967280 }
   0xc   :  { %19 = sfence }
   0xd   :  { %20 = vsyncpa [#allocation5], 0 }
   0xe   :  { %22 = vsyncpa [#allocation5 + $0x1], 0 }
   0xf   :  { %23 = vsyncpa [#allocation8], 0 }
  0x10   :  { %24 = vsyncpa [#allocation6], 0 }
  0x11   :  { %26 = vsyncpa [#allocation6 + $0x1], 0 }
  0x12   :  { %27 = vsyncpa [#allocation12], 0 }
  0x13   :  { %29 = vsyncpa [#allocation12 + $0x1], 0 }
  0x14   :  { %30 = vsyncpa [#allocation15], 0 }
  0x15   :  { %32 = vsyncpa [#allocation15 + $0x1], 0  ;;  %s1577_s23 = smov 0   ;;  %s1579_s24 = smov 0  }
  0x16   :  { %s1581_s25 = smov 0   ;;  %s1583_s26 = smov 0  }
  0x17 LB: > { %s1598_s0 = sadd.s32 4294967295, %s1492_s26   ;;  %s2000_s27 = sadd.s32 4294967294, %s1492_s26   ;;  %s1492_s26 = sphi %s1583_s26, %s2031_s26   ;;  %s1488_s25 = sphi %s1581_s25, %s2030_s25   ;;  %s1484_s24 = sphi %s1579_s24, %s2029_s24   ;;  %s1480_s23 = sphi %s1577_s23, %s2028_s23  }
  0x18   : > { %p58_p3 = scmp.ne.s32.totalorder %s1484_s24, %s1480_s23  ;;  %p1999_p4 = scmp.eq.s32.totalorder %s1598_s0, 0 }
  0x19   : > { %p172_p6 = scmp.eq.s32.totalorder %s2000_s27, 1  ;;  %p1006_p8 = scmp.ge.s32.totalorder %s1492_s26, 1 }
  0x1a   : > { %p1609_p7 = por %p1999_p4, %p58_p3  ;;  %p283_p10 = scmp.lt.s32.totalorder %s1492_s26, 3 }
  0x1b   : > { %p1614_p9 = por %p172_p6, %p58_p3  ;;  %s1495_s11 = smov [#allocation7]  }
  0x1c   : > { %s2008_s28 = scalar_select %p1609_p7, 1, 0 }
  0x1d   : > { %s2009_s29 = scalar_select %p1614_p9, 1, 0 }
  0x1e   : > { %p1619_p11 = pnand %p1006_p8, %p283_p10  ;;  %s295_s12 = sshll.u32 %s1495_s11, 4  ;;  %s1623_s12 = int_to_ptr.vmem [resolvable:$true] %s295_s12 }
  0x1f   : > { %2010 = sst [smem:[#allocation22_spill]] %s2009_s29  ;;  %s1496_s14 = smov [#allocation9]  }
  0x20   : > { %p1139_p12 = pneg %p1619_p11  ;;  %s311_s15 = sshll.u32 %s1496_s14, 4  ;;  %s1634_s15 = int_to_ptr.vmem [resolvable:$true] %s311_s15 }
  0x21   : > { %s2013_s2 = sld [smem:[#allocation24_spill]] }
  0x22   : > { %p1630_p0 = pnand %p1139_p12, %p1999_p4 }
  0x24   : > { %p1244_p2 = pneg %p1630_p0 }
  0x27   : > { %s1242_s18 = scalar_lea.hbm %s2013_s2, 1024 }
  0x28   : > { %p1243_p1 = scmp.ne.s32.totalorder %s2013_s2, %s1242_s18  ;;  %p1249_p8 = scmp.lt.u32.totalorder %s1242_s18, %s2013_s2 }
  0x2a   : > { %p1245_p3 = pnand %p1244_p2, %p1243_p1 }
  0x2c   : > { %p1246_p6 = pneg %p1245_p3 }
  0x2e   : > { %p1251_p10 = pnand %p1249_p8, %p1246_p6 }
  0x30   : > { %1254 = shalt.err (!%p1251_p10)
}
  0x31   : > { %s1255_s11 = scalar_lea.vmem %s1623_s12, 1024  ;;  %p1263_p5 = scmp.lt.s32.totalorder %s1623_s12, %s1623_s12 }
  0x32   : > { %p1256_p12 = scmp.ne.s32.totalorder %s1623_s12, %s1255_s11  ;;  %p1264_p1 = scmp.lt.s32.totalorder %s1255_s11, %s1255_s11 }
  0x34   : > { %p1258_p13 = pnand %p1256_p12, %p1244_p2  ;;  %p1265_p3 = por %p1264_p1, %p1263_p5 }
  0x36   : > { %p1259_p4 = pneg %p1258_p13 }
  0x38   : > { %p1266_p9 = pnand %p1265_p3, %p1259_p4 }
  0x3a   : > { %1269 = shalt.err (!%p1266_p9)
}
  0x3b   : > { %s1497_s14 = smov 64   ;;  %s1498_s16 = smov 4  }
  0x3c   : > { %1142 = dma.hbm_to_vmem [thread:$0]  (!%p1630_p0), %s2013_s2, 1024, %s1623_s12, [#allocation8], %s1497_s14, %s1497_s14, %s1498_s16  }
  0x3d   : > { %s2014_s4 = sld [smem:[#allocation26_spill]] }
  0x43   : > { %s1270_s21 = scalar_lea.hbm %s2014_s4, 1024 }
  0x44   : > { %p1271_p5 = scmp.ne.s32.totalorder %s2014_s4, %s1270_s21  ;;  %p1277_p13 = scmp.lt.u32.totalorder %s1270_s21, %s2014_s4 }
  0x46   : > { %p1273_p4 = pnand %p1271_p5, %p1244_p2 }
  0x48   : > { %p1274_p9 = pneg %p1273_p4 }
  0x4a   : > { %p1279_p6 = pnand %p1277_p13, %p1274_p9 }
  0x4c   : > { %1282 = shalt.err (!%p1279_p6)
}
  0x4d   : > { %s1283_s12 = scalar_lea.vmem %s1634_s15, 1024  ;;  %p1291_p1 = scmp.lt.s32.totalorder %s1634_s15, %s1634_s15 }
  0x4e   : > { %p1284_p8 = scmp.ne.s32.totalorder %s1634_s15, %s1283_s12  ;;  %p1292_p3 = scmp.lt.s32.totalorder %s1283_s12, %s1283_s12 }
  0x50   : > { %p1286_p10 = pnand %p1284_p8, %p1244_p2  ;;  %p1293_p5 = por %p1292_p3, %p1291_p1 }
  0x52   : > { %p1287_p12 = pneg %p1286_p10 }
  0x54   : > { %p1294_p4 = pnand %p1293_p5, %p1287_p12 }
  0x56   : > { %1297 = shalt.err (!%p1294_p4)
}
  0x57   : > { %1145 = dma.hbm_to_vmem [thread:$0]  (!%p1630_p0), %s2014_s4, 1024, %s1634_s15, [#allocation8], %s1497_s14, %s1497_s14, %s1498_s16  }
  0x58   : > { %s1689_s17 = sadd.s32 1, %s1492_s26   ;;  %s45_s13 = sadd.s32 1, %s1488_s25 }
  0x59   : > { %s42_s18 = ssub.s32 %s1492_s26, %s1689_s17  ;;  %p52_p2 = scmp.ne.s32.totalorder %s1488_s25, %s1484_s24 }
  0x5a   : > { %p43_p9 = scmp.eq.s32.totalorder %s42_s18, 0  ;;  %p53_p13 = scmp.eq.s32.totalorder %s1492_s26, 0 }
  0x5b   : > { %p2015_p6 = scmp.eq.s32.totalorder %s1598_s0, 1  ;;  %p1165_p10 = scmp.lt.s32.totalorder %s1492_s26, 2 }
  0x5c   : > { %s1705_s20 = scalar_select %p43_p9, %s1488_s25, %s45_s13  }
  0x5d   : > { %p1699_p8 = por %p2015_p6, %p52_p2  ;;  %p54_p12 = por %p53_p13, %p52_p2 }
  0x5e   : > { %s328_s21 = sand.u32 1, %s1488_s25   ;;  %s1055_s15 = sshll.u32 %s1492_s26, 8 }
  0x5f   : > { %s2016_s19 = scalar_select %p1699_p8, 1, 0 }
  0x60   : > { %s1010_s22 = sshll.u32 %s328_s21, 4  ;;  %s2017_s1 = sld [smem:[#allocation23_spill]] }
  0x61   : > { %s332_s12 = scalar_lea.vmem [#allocation4], %s1010_s22  ;;  %p1716_p0 = pnand %p1165_p10, %p54_p12 }
  0x62   : > { %s339_s27 = sshll.u32 %s332_s12, 4  ;;  %s1720_s13 = scalar_lea.sflag [#allocation5], %s328_s21  ;;  %s1714_s27 = int_to_ptr.vmem [resolvable:$true] %s339_s27 }
  0x63   : > { %p1300_p3 = pneg %p1716_p0 }
  0x66   : > { %s1712_s11 = scalar_lea.hbm %s2017_s1, %s1055_s15  ;;  %s1303_s14 = scalar_lea.hbm %s2017_s1, 512 }
  0x67   : > { %s1298_s18 = scalar_lea.hbm %s1712_s11, 256  ;;  %p1304_p2 = scmp.lt.u32.totalorder %s1712_s11, %s2017_s1 }
  0x68   : > { %p1299_p1 = scmp.ne.s32.totalorder %s1712_s11, %s1298_s18  ;;  %p1305_p9 = scmp.lt.u32.totalorder %s1303_s14, %s1298_s18 }
  0x69   : > { %p1307_p6 = scmp.lt.u32.totalorder %s1298_s18, %s1712_s11 }
  0x6a   : > { %p1301_p5 = pnand %p1300_p3, %p1299_p1  ;;  %p1306_p13 = por %p1305_p9, %p1304_p2 }
  0x6c   : > { %p1302_p4 = pneg %p1301_p5  ;;  %p1308_p10 = por %p1307_p6, %p1306_p13 }
  0x6e   : > { %p1309_p12 = pnand %p1308_p10, %p1302_p4 }
  0x70   : > { %1312 = shalt.err (!%p1309_p12)
}
  0x71   : > { %s1313_s21 = scalar_lea.vmem %s1714_s27, 256  ;;  %s1499_s22 = smov [#allocation4]  }
  0x72   : > { %p1314_p1 = scmp.ne.s32.totalorder %s1714_s27, %s1313_s21  ;;  %s1318_s15 = sshll.u32 %s1499_s22, 4  ;;  %s1319_s15 = int_to_ptr.vmem [resolvable:$false] %s1318_s15 }
  0x73   : > { %s1320_s16 = scalar_lea.vmem %s1319_s15, 512  ;;  %p1321_p7 = scmp.lt.s32.totalorder %s1714_s27, %s1319_s15 }
  0x74   : > { %p1316_p5 = pnand %p1314_p1, %p1300_p3  ;;  %p1322_p2 = scmp.lt.s32.totalorder %s1320_s16, %s1313_s21 }
  0x76   : > { %p1317_p8 = pneg %p1316_p5  ;;  %p1323_p9 = por %p1322_p2, %p1321_p7 }
  0x78   : > { %p1324_p13 = pnand %p1323_p9, %p1317_p8 }
  0x7a   : > { %1327 = shalt.err (!%p1324_p13)
}
  0x7b   : > { %s1500_s18 = smov 128   ;;  %s1501_s14 = smov 8  }
  0x7c   : > { %1149 = dma.hbm_to_vmem [thread:$0]  (!%p1716_p0), %s1712_s11, 256, %s1714_s27, %s1720_s13, %s1500_s18, %s1500_s18, %s1501_s14  }
  0x7d   : > { %351 = sbr.rel (%p1619_p11) target bundleno = 829 (0x33d), region = 40  ;;  %s1751_s12 = sand.u32 (!%p1619_p11), 1, %s1484_s24  }
  0x7e   : > { %s1754_s21 = sshll.u32 (!%p1619_p11), %s1751_s12, 4  ;;  %s354_s22 = scalar_lea.sflag (!%p1619_p11), [#allocation5], %s1751_s12 }
  0x7f   : > { %s1758_s15 = scalar_lea.vmem (!%p1619_p11), [#allocation4], %s1754_s21  ;;  %p2019_p7 = scmp.ne.s32.totalorder (!%p1619_p11), %s2008_s28, 0 }
  0x84   : > { %1459 = dma.done.wait (%p2019_p7), %s354_s22, 256  }
  0x85   : > { %1461 = vsyncadd (%p2019_p7), %s354_s22, 4294967040  ;;  %p2020_p8 = scmp.eq.s32.totalorder %s1598_s0, 0 }
  0x87   : > { %1463 = dma.done.wait (%p2020_p8), [#allocation8], 2048   ;;  %p2021_p11 = pmov %p2020_p8 }
  0x88   : > { %v1502_v0 = vmov 0.0   ;;  %vm1503_vm0 = vmmov 0   ;;  %s1021_s30 = sshll.u32 %s1598_s0, 1  ;;  %v1212_v1 = vld [vmem:[#allocation7] sm:$0xff]   ;;  %v1213_v2 = vld [vmem:[#allocation7 + $0x8] sm:$0xff]   ;;  %v1214_v3 = vld [vmem:[#allocation7 + $0x10] sm:$0xff]   ;;  %v679_v34 = vlaneseq }
  0x89   : > { %1465 = vsyncadd (%p2021_p11), [#allocation8], 4294965248  ;;  %1077 = vmatprep.subr.bf16.mxu0 %v1502_v0  ;;  %1093 = vmatprep.mubr.msk.bf16.mxu0 %vm1503_vm0, %v1502_v0  ;;  %s437_s28 = sadd.s32 1, %s1021_s30  ;;  %s1773_s11 = sld [smem:[#allocation3 + %s1021_s30]]  ;;  %v426_v4 = vld [vmem:[%s1758_s15] sm:$0xff]  ;;  %v427_v5 = vld [vmem:[%s1758_s15 + $0x8] sm:$0xff] }
  0x8a   : > { %1097 = vmatprep.subr.bf16.mxu1 %v1502_v0  ;;  %1113 = vmatprep.mubr.msk.bf16.mxu1 %vm1503_vm0, %v1502_v0  ;;  %s1775_s27 = sld [smem:[#allocation3 + %s437_s28]]  ;;  %s1780_s29 = scalar_lea.vmem [#allocation10], %s1754_s21  ;;  %v1220_v6 = vld [vmem:[#allocation9] sm:$0xff]   ;;  %v1215_v7 = vld [vmem:[#allocation7 + $0x18] sm:$0xff]   ;;  %v1221_v8 = vld [vmem:[#allocation9 + $0x8] sm:$0xff]   ;;  %v680_v35 = vshrl.u32 %v679_v34, 7 }
  0x8b   : > { %1078 = vmatpush3.bf16.msra.mxu0 %v1212_v1  ;;  %428 = vst [vmem:[%s1780_s29] sm:$0xff] %v426_v4  ;;  %429 = vst [vmem:[%s1780_s29 + $0x8] sm:$0xff] %v427_v5  ;;  %1098 = vmatpush3.bf16.msra.mxu1 %v1220_v6  ;;  %v1216_v9 = vld [vmem:[#allocation7 + $0x20] sm:$0xff]   ;;  %v1222_v10 = vld [vmem:[#allocation9 + $0x10] sm:$0xff]   ;;  %s2022_s3 = sld [smem:[#allocation25_spill]]  ;;  %s1810_s22 = scalar_lea.vmem [#allocation13], %s1754_s21 }
  0x8c   : > { %1079 = vmatprep.subr.bf16.mxu0 %v1502_v0  ;;  %1099 = vmatprep.subr.bf16.mxu1 %v1502_v0  ;;  %v1217_v11 = vld [vmem:[#allocation7 + $0x28] sm:$0xff]   ;;  %v1223_v12 = vld [vmem:[#allocation9 + $0x18] sm:$0xff]   ;;  %v1218_v13 = vld [vmem:[#allocation7 + $0x30] sm:$0xff]   ;;  %v681_v36 = vsub.s32 0, %v680_v35  ;;  %p2023_p3 = scmp.ne.s32.totalorder %s2016_s19, 0  ;;  %s1504_s2 = smov [#allocation11]  }
  0x8d   : > { %v1219_v14 = vld [vmem:[#allocation7 + $0x38] sm:$0xff]   ;;  %v1224_v18 = vld [vmem:[#allocation9 + $0x20] sm:$0xff]   ;;  %v1225_v19 = vld [vmem:[#allocation9 + $0x28] sm:$0xff]  }
  0x8e   : > { %v1226_v20 = vld [vmem:[#allocation9 + $0x30] sm:$0xff]   ;;  %v1227_v21 = vld [vmem:[#allocation9 + $0x38] sm:$0xff]   ;;  %v1033_v37 = vld [vmem:[%s1993_s5] ss:$0 sm:$0xff] }
  0x8f   : > { %1080 = vmatpush3.bf16.msra.mxu0 %v1213_v2  ;;  %s435_s13 = scalar_lea.vmem %s1780_s29, %s1773_s11 [#allocation10]  ;;  %1100 = vmatpush3.bf16.msra.mxu1 %v1221_v8  ;;  %s432_s30 = scalar_lea.vmem %s1758_s15, %s1773_s11 [#allocation4] }
  0x90   : > { %1081 = vmatprep.subr.bf16.mxu0 %v1502_v0  ;;  %s891_s16 = scalar_lea.vmem %s1780_s29, %s1775_s27 [#allocation10]  ;;  %436 = vst [vmem:[%s435_s13] sm:$0x1] %v1502_v0  ;;  %1101 = vmatprep.subr.bf16.mxu1 %v1502_v0  ;;  %s889_s28 = scalar_lea.vmem %s1758_s15, %s1775_s27 [#allocation4]  ;;  %v433_v32 = vld [vmem:[%s432_s30] sm:$0x1] }
  0x91   : > { %1023 = vst [vmem:[%s891_s16 + $0x8] sm:$0x1] %v1502_v0  ;;  %v1024_v22 = vld [vmem:[%s2022_s3] ss:$0 sm:$0xff]  ;;  %s1018_s13 = sshll.u32 %s1751_s12, 1  ;;  %v682_v38 = vrot.slane %v433_v32, %v681_v36  ;;  %s412_s15 = scalar_lea.vmem [#allocation14], %s1754_s21 }
  0x92   : > { %v1022_v33 = vld [vmem:[%s889_s28 + $0x8] sm:$0x1]  ;;  %s1819_s16 = scalar_lea.vmem [#allocation11], %s1018_s13  ;;  %s792_s11 = sshll.u32 %s412_s15, 4  ;;  %s1827_s11 = int_to_ptr.vmem [resolvable:$true] %s792_s11 }
  0x93   : > { %1082 = vmatpush3.bf16.msra.mxu0 %v1214_v3  ;;  %1102 = vmatpush3.bf16.msra.mxu1 %v1222_v10  ;;  %434 = vst [vmem:[%s1819_s16] sm:$0x1] %v433_v32  ;;  %442 = vst [vmem:[%s1819_s16 + $0x1] sm:$0x1] %v1022_v33  ;;  %v699_v42 = vrot.slane %v1022_v33, %v681_v36  ;;  %s720_s27 = sand.u32 1, %s1598_s0   ;;  %s1048_s30 = sshll.u32 %s1598_s0, 5 }
  0x94   : > { %1083 = vmatprep.subr.bf16.mxu0 %v1502_v0  ;;  %1103 = vmatprep.subr.bf16.mxu1 %v1502_v0  ;;  %s1834_s21 = scalar_lea.hbm %s1995_s7, %s1048_s30  ;;  %s763_s18 = sshll.u32 %s1819_s16, 4  ;;  %s764_s18 = int_to_ptr.vmem [resolvable:$true] %s763_s18 }
  0x95   : > { %s1837_s14 = scalar_lea.sflag [#allocation12], %s720_s27  ;;  %s1328_s1 = scalar_lea.vmem %s764_s18, 32 }
  0x96   : > { %p1329_p0 = scmp.ne.s32.totalorder %s764_s18, %s1328_s1 }
  0x97   : > { %1084 = vmatpush3.bf16.msra.mxu0 %v1215_v7  ;;  %1104 = vmatpush3.bf16.msra.mxu1 %v1223_v12 }
  0x98   : > { %1085 = vmatprep.subr.bf16.mxu0 %v1502_v0  ;;  %1105 = vmatprep.subr.bf16.mxu1 %v1502_v0  ;;  %v445_v15 = vld [vmem:[%s1780_s29] sm:$0xff]  ;;  %v446_v16 = vld [vmem:[%s1780_s29 + $0x8] sm:$0xff]  ;;  %p1330_p4 = pnand %p1329_p0, %p2023_p3 }
  0x99   : > { %v447_v17 = vpack.c.bf16 %v446_v16, %v445_v15 }
  0x9a   : > { %p1331_p6 = pneg %p1330_p4 }
  0x9b   : > { %1086 = vmatpush3.bf16.msra.mxu0 %v1216_v9  ;;  %1106 = vmatpush3.bf16.msra.mxu1 %v1224_v18 }
  0x9c   : > { %1087 = vmatprep.subr.bf16.mxu0 %v1502_v0  ;;  %1107 = vmatprep.subr.bf16.mxu1 %v1502_v0 }
  0x9f   : > { %1088 = vmatpush3.bf16.msra.mxu0 %v1217_v11  ;;  %1108 = vmatpush3.bf16.msra.mxu1 %v1225_v19 }
  0xa0   : > { %1089 = vmatprep.subr.bf16.mxu0 %v1502_v0  ;;  %1109 = vmatprep.subr.bf16.mxu1 %v1502_v0 }
  0xa3   : > { %1090 = vmatpush3.bf16.msra.mxu0 %v1218_v13  ;;  %1110 = vmatpush3.bf16.msra.mxu1 %v1226_v20 }
  0xa4   : > { %1091 = vmatprep.subr.bf16.mxu0 %v1502_v0  ;;  %1111 = vmatprep.subr.bf16.mxu1 %v1502_v0 }
  0xa7   : > { %1092 = vmatpush3.bf16.msra.mxu0 %v1219_v14  ;;  %1112 = vmatpush3.bf16.msra.mxu1 %v1227_v21 }
  0xaa   : > { %1094 = vmatmul.mubr.bf16.vlgmr.msra.gmra.mrb[0].mxu0 %v447_v17 }
 0x17d   : > { %v553_v23 = vpop.f32.mrb[0].mxu0 }
 0x17e   : > { %v554_v24 = vadd.f32 %v1024_v22, %v553_v23  ;;  %v1095_v25 = vpop.f32.mrb[1].mxu0 }
 0x17f   : > { %v556_v26 = vpop.f32.mrb[2].mxu0 }
 0x180   : > { %1228 = vtanh.f32 %v554_v24  ;;  %v557_v27 = vadd.f32 %v1024_v22, %v556_v26  ;;  %v1096_v28 = vpop.f32.mrb[3].mxu0 }
 0x182   : > { %1230 = vtanh.f32 %v557_v27 }
 0x18a   : > { %v1229_v29 = vpop.eup %1228 }
 0x18b   : > { %562 = vst [vmem:[%s1810_s22] sm:$0xff] %v1229_v29 }
 0x18c   : > { %v1231_v30 = vpop.eup %1230 }
 0x18d   : > { %v564_v31 = vpack.c.bf16 %v1231_v30, %v1229_v29  ;;  %563 = vst [vmem:[%s1810_s22 + $0x8] sm:$0xff] %v1231_v30 }
 0x18f   : > { %1114 = vmatmul.mubr.bf16.vlgmr.msra.gmra.mrb[0].mxu1 %v564_v31 }
 0x262   : > { %v670_v39 = vpop.f32.mrb[0].mxu1 }
 0x263   : > { %v671_v40 = vadd.f32 %v1033_v37, %v670_v39  ;;  %v1115_v41 = vpop.f32.mrb[1].mxu1 }
 0x264   : > { %v673_v43 = vpop.f32.mrb[2].mxu1 }
 0x265   : > { %677 = vst [vmem:[%s412_s15] sm:$0xff] %v671_v40  ;;  %v674_v44 = vadd.f32 %v1033_v37, %v673_v43  ;;  %v1116_v45 = vpop.f32.mrb[3].mxu1  ;;  %v683_v46 = vsub.f32 %v671_v40, %v682_v38 }
 0x267   : > { %678 = vst [vmem:[%s412_s15 + $0x8] sm:$0xff] %v674_v44  ;;  %v684_v47 = vmul.f32 %v683_v46, %v683_v46  ;;  %v700_v48 = vsub.f32 %v674_v44, %v699_v42  ;;  %s1332_s15 = sshll.u32 %s1504_s2, 4  ;;  %s1333_s15 = int_to_ptr.vmem [resolvable:$false] %s1332_s15 }
 0x268   : > { %s1334_s3 = scalar_lea.vmem %s1333_s15, 64  ;;  %p1335_p10 = scmp.lt.s32.totalorder %s764_s18, %s1333_s15 }
 0x269   : > { %685 = vadd.xlane.f32.xlu0 %v684_v47  ;;  %v701_v49 = vmul.f32 %v700_v48, %v700_v48  ;;  %p1336_p12 = scmp.lt.s32.totalorder %s1334_s3, %s1328_s1 }
 0x26b   : > { %p1337_p1 = por %p1336_p12, %p1335_p10 }
 0x26d   : > { %702 = vadd.xlane.f32.xlu0 %v701_v49  ;;  %p1338_p5 = pnand %p1337_p1, %p1331_p6 }
 0x26f   : > { %1341 = shalt.err (!%p1338_p5)
}
 0x270   : > { %s1342_s16 = scalar_lea.hbm %s1834_s21, 32  ;;  %s1346_s2 = scalar_lea.hbm %s1995_s7, 64 }
 0x271   : > { %p1343_p2 = scmp.ne.s32.totalorder %s1834_s21, %s1342_s16  ;;  %p1347_p7 = scmp.lt.u32.totalorder %s1834_s21, %s1995_s7 }
 0x272   : > { %p1348_p8 = scmp.lt.u32.totalorder %s1346_s2, %s1342_s16  ;;  %p1350_p0 = scmp.lt.u32.totalorder %s1342_s16, %s1834_s21 }
 0x273   : > { %p1344_p9 = pnand %p1343_p2, %p2023_p3 }
 0x274   : > { %p1349_p11 = por %p1348_p8, %p1347_p7 }
 0x275   : > { %p1345_p13 = pneg %p1344_p9 }
 0x276   : > { %p1351_p4 = por %p1350_p0, %p1349_p11 }
 0x278   : > { %p1352_p6 = pnand %p1351_p4, %p1345_p13 }
 0x27a   : > { %1355 = shalt.err (!%p1352_p6)
}
 0x27b   : > { %1132 = dma.vmem_to_hbm [thread:$0]  (%p2023_p3), %s764_s18, 32, %s1834_s21, %s1837_s14  }
 0x27c   : > { %s1858_s1 = sshll.u32 %s1598_s0, 8  ;;  %s747_s3 = sshll.u32 %s1780_s29, 4  ;;  %s1867_s3 = int_to_ptr.vmem [resolvable:$true] %s747_s3 }
 0x27d   : > { %s1865_s16 = scalar_lea.hbm %s1994_s6, %s1858_s1  ;;  %s716_s30 = scalar_lea.sflag [#allocation6], %s1751_s12 }
 0x27e   : > { %s1356_s2 = scalar_lea.vmem %s1867_s3, 256  ;;  %s1505_s21 = smov [#allocation10]  }
 0x27f   : > { %p1357_p10 = scmp.ne.s32.totalorder %s1867_s3, %s1356_s2  ;;  %s1360_s18 = sshll.u32 %s1505_s21, 4  ;;  %s1361_s18 = int_to_ptr.vmem [resolvable:$false] %s1360_s18 }
 0x280   : > { %s1362_s29 = scalar_lea.vmem %s1361_s18, 512  ;;  %p1363_p5 = scmp.lt.s32.totalorder %s1867_s3, %s1361_s18 }
 0x281   : > { %p1358_p12 = pnand %p1357_p10, %p2023_p3  ;;  %p1364_p2 = scmp.lt.s32.totalorder %s1362_s29, %s1356_s2 }
 0x283   : > { %p1359_p1 = pneg %p1358_p12  ;;  %p1365_p9 = por %p1364_p2, %p1363_p5 }
 0x285   : > { %p1366_p13 = pnand %p1365_p9, %p1359_p1 }
 0x287   : > { %1369 = shalt.err (!%p1366_p13)
}
 0x288   : > { %s1370_s28 = scalar_lea.hbm %s1865_s16, 256  ;;  %s1374_s27 = scalar_lea.hbm %s1994_s6, 512 }
 0x289   : > { %p1371_p7 = scmp.ne.s32.totalorder %s1865_s16, %s1370_s28  ;;  %p1375_p0 = scmp.lt.u32.totalorder %s1865_s16, %s1994_s6 }
 0x28a   : > { %p1376_p4 = scmp.lt.u32.totalorder %s1374_s27, %s1370_s28  ;;  %p1378_p10 = scmp.lt.u32.totalorder %s1370_s28, %s1865_s16 }
 0x28b   : > { %p1372_p8 = pnand %p1371_p7, %p2023_p3 }
 0x28c   : > { %p1377_p6 = por %p1376_p4, %p1375_p0 }
 0x28d   : > { %p1373_p11 = pneg %p1372_p8 }
 0x28e   : > { %p1379_p12 = por %p1378_p10, %p1377_p6 }
 0x290   : > { %p1380_p1 = pnand %p1379_p12, %p1373_p11 }
 0x292   : > { %1383 = shalt.err (!%p1380_p1)
}
 0x293   : > { %s1506_s2 = smov 128   ;;  %s1507_s29 = smov 8  }
 0x294   : > { %1131 = dma.vmem_to_hbm [thread:$0]  (%p2023_p3), %s1867_s3, 256, %s1865_s16, %s716_s30, %s1506_s2, %s1506_s2, %s1507_s29  }
 0x295   : > { %s1900_s15 = scalar_lea.hbm %s1996_s8, %s1858_s1  ;;  %s776_s27 = sshll.u32 %s1810_s22, 4  ;;  %s1903_s27 = int_to_ptr.vmem [resolvable:$true] %s776_s27 }
 0x296   : > { %s1384_s21 = scalar_lea.vmem %s1903_s27, 256  ;;  %s1508_s18 = smov [#allocation13]  }
 0x297   : > { %p1385_p5 = scmp.ne.s32.totalorder %s1903_s27, %s1384_s21  ;;  %s1388_s4 = sshll.u32 %s1508_s18, 4  ;;  %s1389_s4 = int_to_ptr.vmem [resolvable:$false] %s1388_s4 }
 0x298   : > { %s1390_s3 = scalar_lea.vmem %s1389_s4, 512  ;;  %p1391_p13 = scmp.lt.s32.totalorder %s1903_s27, %s1389_s4 }
 0x299   : > { %p1386_p2 = pnand %p1385_p5, %p2023_p3  ;;  %p1392_p7 = scmp.lt.s32.totalorder %s1390_s3, %s1384_s21 }
 0x29b   : > { %p1387_p9 = pneg %p1386_p2  ;;  %p1393_p8 = por %p1392_p7, %p1391_p13 }
 0x29d   : > { %p1394_p11 = pnand %p1393_p8, %p1387_p9 }
 0x29f   : > { %1397 = shalt.err (!%p1394_p11)
}
 0x2a0   : > { %s1398_s22 = scalar_lea.hbm %s1900_s15, 256  ;;  %s1402_s13 = scalar_lea.hbm %s1996_s8, 512 }
 0x2a1   : > { %p1399_p0 = scmp.ne.s32.totalorder %s1900_s15, %s1398_s22  ;;  %p1403_p10 = scmp.lt.u32.totalorder %s1900_s15, %s1996_s8 }
 0x2a2   : > { %p1404_p12 = scmp.lt.u32.totalorder %s1402_s13, %s1398_s22  ;;  %p1406_p5 = scmp.lt.u32.totalorder %s1398_s22, %s1900_s15 }
 0x2a3   : > { %p1400_p4 = pnand %p1399_p0, %p2023_p3 }
 0x2a4   : > { %p1405_p1 = por %p1404_p12, %p1403_p10 }
 0x2a5   : > { %p1401_p6 = pneg %p1400_p4 }
 0x2a6   : > { %p1407_p2 = por %p1406_p5, %p1405_p1 }
 0x2a8   : > { %p1408_p9 = pnand %p1407_p2, %p1401_p6 }
 0x2aa   : > { %1411 = shalt.err (!%p1408_p9)
}
 0x2ab   : > { %1133 = dma.vmem_to_hbm [thread:$0]  (%p2023_p3), %s1903_s27, 256, %s1900_s15, %s1837_s14, %s1506_s2, %s1506_s2, %s1507_s29  }
 0x2ac   : > { %s1934_s3 = scalar_lea.hbm %s1997_s9, %s1858_s1  ;;  %s731_s22 = scalar_lea.sflag [#allocation15], %s1751_s12 }
 0x2ad   : > { %s1412_s16 = scalar_lea.vmem %s1827_s11, 256  ;;  %s1509_s30 = smov [#allocation14]  }
 0x2ae   : > { %p1413_p13 = scmp.ne.s32.totalorder %s1827_s11, %s1412_s16  ;;  %s1416_s13 = sshll.u32 %s1509_s30, 4  ;;  %s1417_s13 = int_to_ptr.vmem [resolvable:$false] %s1416_s13 }
 0x2af   : > { %s1418_s28 = scalar_lea.vmem %s1417_s13, 512  ;;  %p1419_p11 = scmp.lt.s32.totalorder %s1827_s11, %s1417_s13 }
 0x2b0   : > { %p1414_p7 = pnand %p1413_p13, %p2023_p3  ;;  %p1420_p0 = scmp.lt.s32.totalorder %s1418_s28, %s1412_s16 }
 0x2b2   : > { %p1415_p8 = pneg %p1414_p7  ;;  %p1421_p4 = por %p1420_p0, %p1419_p11 }
 0x2b4   : > { %p1422_p6 = pnand %p1421_p4, %p1415_p8 }
 0x2b6   : > { %1425 = shalt.err (!%p1422_p6)
}
 0x2b7   : > { %s1426_s14 = scalar_lea.hbm %s1934_s3, 256  ;;  %s1430_s27 = scalar_lea.hbm %s1997_s9, 512 }
 0x2b8   : > { %p1427_p10 = scmp.ne.s32.totalorder %s1934_s3, %s1426_s14  ;;  %p1431_p5 = scmp.lt.u32.totalorder %s1934_s3, %s1997_s9 }
 0x2b9   : > { %p1432_p2 = scmp.lt.u32.totalorder %s1430_s27, %s1426_s14  ;;  %p1434_p13 = scmp.lt.u32.totalorder %s1426_s14, %s1934_s3 }
 0x2ba   : > { %p1428_p12 = pnand %p1427_p10, %p2023_p3 }
 0x2bb   : > { %p1433_p9 = por %p1432_p2, %p1431_p5 }
 0x2bc   : > { %p1429_p1 = pneg %p1428_p12 }
 0x2bd   : > { %p1435_p7 = por %p1434_p13, %p1433_p9 }
 0x2bf   : > { %p1436_p8 = pnand %p1435_p7, %p1429_p1 }
 0x2c1   : > { %1439 = shalt.err (!%p1436_p8)
}
 0x2c2   : > { %1134 = dma.vmem_to_hbm [thread:$0]  (%p2023_p3), %s1827_s11, 256, %s1934_s3, %s731_s22, %s1506_s2, %s1506_s2, %s1507_s29   ;;  %vm713_vm1 = vcmask 0  }
 0x2c3   : > { %p422_p11 = scmp.lt.s32.totalorder %s1598_s0, 1 }
 0x2c5   : > { %s2033_s0 = smov (!%p422_p11, %s1598_s0), 1 }
 0x2c6   : > { %s424_s29 = scalar_lea.vmem %s1998_s10, %s2033_s0 }
 0x2f6   : > { %v686_v50 = vpop.xlane.xlu0 %685 }
 0x2f7   : > { %v687_v51 = vrot.slane %v686_v50, 4 }
 0x2f9   : > { %v688_v52 = vadd.f32 %v687_v51, %v686_v50 }
 0x2fa   : > { %v703_v53 = vpop.xlane.xlu0 %702 }
 0x2fb   : > { %v689_v54 = vrot.slane %v688_v52, 2  ;;  %v704_v55 = vrot.slane %v703_v53, 4 }
 0x2fd   : > { %v705_v56 = vadd.f32 %v704_v55, %v703_v53  ;;  %v690_v57 = vadd.f32 %v689_v54, %v688_v52 }
 0x2ff   : > { %v706_v58 = vrot.slane %v705_v56, 2  ;;  %v691_v59 = vrot.slane %v690_v57, 1 }
 0x301   : > { %v707_v60 = vadd.f32 %v706_v58, %v705_v56  ;;  %v692_v61 = vadd.f32 %v691_v59, %v690_v57 }
 0x303   : > { %1117 = vpush %v692_v61  ;;  %v708_v62 = vrot.slane %v707_v60, 1 }
 0x305   : > { %v709_v63 = vadd.f32 %v708_v62, %v707_v60 }
 0x307   : > { %1119 = vpush %v709_v63 }
 0x334   : > { %s1118_s19 = spop %1117 }
 0x335   : > { %v694_v0 = vstv %s1118_s19 }
 0x338   : > { %s1120_s12 = spop %1119 }
 0x339   : > { %v711_v1 = vstv %s1120_s12 }
 0x33a   : > { %v712_v2 = vadd.f32 %v711_v1, %v694_v0 }
 0x33c   : > { %714 = vst.msk [vmem:[%s424_s29] sm:$0x1] %vm713_vm1, %v712_v2 }
 0x33d PF: > { %s2024_s18 = sld [smem:[#allocation22_spill]]  ;;  %s810_s3 = sand.u32 1, %s1480_s23  }
 0x33e   : > { %p2026_p0 = scmp.ge.s32.totalorder %s1492_s26, 2  ;;  %s811_s22 = scalar_lea.sflag [#allocation6], %s810_s3 }
 0x343   : > { %p2025_p3 = scmp.ne.s32.totalorder %s2024_s18, 0 }
 0x345   : > { %p1151_p4 = pnand %p2026_p0, %p2025_p3 }
 0x347   : > { %1467 = dma.done.wait (!%p1151_p4), %s811_s22, 256  }
 0x348   : > { %1469 = vsyncadd (!%p1151_p4), %s811_s22, 4294967040  ;;  %s2027_s16 = sadd.s32 4294967294, %s1492_s26  }
 0x349   : > { %s819_s30 = sand.u32 1, %s2027_s16  }
 0x34a   : > { %s820_s13 = scalar_lea.sflag [#allocation12], %s819_s30 }
 0x34b   : > { %1471 = dma.done.wait (!%p1151_p4), %s820_s13, 288  }
 0x34c   : > { %1473 = vsyncadd (!%p1151_p4), %s820_s13, 4294967008  ;;  %s838_s0 = scalar_lea.sflag [#allocation15], %s810_s3 }
 0x34d   : > { %1475 = dma.done.wait (!%p1151_p4), %s838_s0, 256  }
 0x34e   : > { %1477 = vsyncadd (!%p1151_p4), %s838_s0, 4294967040  ;;  %p35_p6 = scmp.ge.s32.totalorder %s1689_s17, 4   ;;  %s2028_s23 = smov %s1484_s24 }
 0x34f   : > { %s2029_s24 = smov %s1488_s25  ;;  %s2030_s25 = smov %s1705_s20 }
 0x350   : > { %s2031_s26 = smov %s1689_s17  ;;  %37 = sbr.rel (!%p35_p6) target bundleno = 23 (0x17), region = 158 }
 0x357   :  { %849 = vsyncpa [#allocation5], 1 }
 0x358   :  { %851 = vsyncpa [#allocation5 + $0x1], 1 }
 0x359   :  { %852 = vsyncpa [#allocation8], 1 }
 0x35a   :  { %853 = vsyncpa [#allocation6], 1 }
 0x35b   :  { %855 = vsyncpa [#allocation6 + $0x1], 1 }
 0x35c   :  { %856 = vsyncpa [#allocation12], 1 }
 0x35d   :  { %858 = vsyncpa [#allocation12 + $0x1], 1 }
 0x35e   :  { %859 = vsyncpa [#allocation15], 1 }
 0x35f   :  { %861 = vsyncpa [#allocation15 + $0x1], 1 }

</bundles_post_ra>
